<compile_context>
chip_gen: v7x
topology: tpu7x:2x2x1
jax: 0.10.0
libtpu: 0.0.40
codegen_flags: <defaults>
</compile_context>

<pallas_src>
import jax
import jax.numpy as jnp
from jax.experimental import pallas as pl
from jax.experimental.pallas import tpu as pltpu

_NEG_PAD = -1e30  # finite "minus infinity" for padded class columns


def _ce_kernel(logits_ref, lbs_ref, out_ref, m_sc, l_sc, sxy_sc, sy_sc):
    j = pl.program_id(1)  # class-tile index (reduction axis, last grid axis)

    @pl.when(j == 0)
    def _init():
        m_sc[...] = jnp.full_like(m_sc, -jnp.inf)
        l_sc[...] = jnp.zeros_like(l_sc)
        sxy_sc[...] = jnp.zeros_like(sxy_sc)
        sy_sc[...] = jnp.zeros_like(sy_sc)

    x = logits_ref[...].astype(jnp.float32)   # (TN, TC)
    y = lbs_ref[...].astype(jnp.float32)      # (TN, TC)

    # Online logsumexp over the class axis (keepdims -> (TN, 1) sublane layout).
    m_prev = m_sc[...]
    m_new = jnp.maximum(m_prev, jnp.max(x, axis=1, keepdims=True))
    l_sc[...] = (l_sc[...] * jnp.exp(m_prev - m_new)
                 + jnp.sum(jnp.exp(x - m_new), axis=1, keepdims=True))
    sxy_sc[...] += jnp.sum(y * x, axis=1, keepdims=True)
    sy_sc[...] += jnp.sum(y, axis=1, keepdims=True)
    m_sc[...] = m_new

    @pl.when(j == pl.num_programs(1) - 1)
    def _finalize():
        # per-row loss = sum(y) * logsumexp(x) - sum(y * x)
        out_ref[...] = (sy_sc[...] * (m_sc[...] + jnp.log(l_sc[...]))
                        - sxy_sc[...])


def _round_up(x, m):
    return ((x + m - 1) // m) * m


def cross_entropy_loss(logits: jax.Array, lbs: jax.Array,
                       *, tn: int | None = None, tc: int | None = None) -> jax.Array:
    """Pallas TPU implementation of the PyTorch CrossEntropyLoss forward."""
    assert logits.shape == lbs.shape and logits.ndim == 2
    n, c = logits.shape

    # ---- tile sizes -------------------------------------------------------
    # Class tile: lane-dense multiple of 128.  Batch tile: multiple of 8 rows.
    if tc is None:
        tc = min(512, _round_up(c, 128))
    if tn is None:
        tn = min(512, _round_up(n, 8))
    assert tc % 128 == 0 and tn % 8 == 0

    c_pad = _round_up(c, tc)
    n_pad = _round_up(n, tn)

    # ---- pad inputs: pad classes with a huge-negative logit / zero label,
    #      pad batch rows with zeros -> padded entries contribute exactly 0.
    if c_pad != c:
        logits = jnp.pad(logits, ((0, 0), (0, c_pad - c)),
                         constant_values=_NEG_PAD)
        lbs = jnp.pad(lbs, ((0, 0), (0, c_pad - c)))
    if n_pad != n:
        logits = jnp.pad(logits, ((0, n_pad - n), (0, 0)))
        lbs = jnp.pad(lbs, ((0, n_pad - n), (0, 0)))

    grid = (n_pad // tn, c_pad // tc)

    per_row = pl.pallas_call(
        _ce_kernel,
        out_shape=jax.ShapeDtypeStruct((n_pad, 1), jnp.float32),
        grid_spec=pltpu.PrefetchScalarGridSpec(
            num_scalar_prefetch=0,
            grid=grid,
            in_specs=[
                pl.BlockSpec((tn, tc), lambda i, j: (i, j)),
                pl.BlockSpec((tn, tc), lambda i, j: (i, j)),
            ],
            out_specs=pl.BlockSpec((tn, 1), lambda i, j: (i, 0)),
            scratch_shapes=[pltpu.VMEM((tn, 1), jnp.float32)] * 4,
        ),
        compiler_params=pltpu.CompilerParams(
            dimension_semantics=("parallel", "arbitrary")),
    )(logits, lbs)

    # Mean over the *global* (unpadded) batch size, done in the wrapper.
    return jnp.sum(per_row[:n, 0]) / jnp.float32(n)


def _reference(logits, lbs):
    log_scores = jax.nn.log_softmax(logits.astype(jnp.float32), axis=1)
    return jnp.mean(jnp.sum(-log_scores * lbs.astype(jnp.float32), axis=1))


if __name__ == "__main__":
    key = jax.random.PRNGKey(0)
    k1, k2, k3, k4 = jax.random.split(key, 4)

    # Small shapes consistent with the module: batch of 8, 32 classes.
    N, C = 8, 32
    logits = jax.random.normal(k1, (N, C), dtype=jnp.float32)
    # Soft labels (a probability distribution per row, like the PyTorch usage).
    lbs = jax.nn.softmax(jax.random.normal(k2, (N, C), dtype=jnp.float32), axis=1)

    loss = cross_entropy_loss(logits, lbs)
    jax.block_until_ready(loss)
    ref = _reference(logits, lbs)
    assert jnp.allclose(loss, ref, atol=1e-4, rtol=1e-5), (loss, ref)

    # Second check: non-aligned shapes + small forced tiles to exercise batch
    # padding and the online-logsumexp scan over multiple class tiles.
    N2, C2 = 10, 200
    logits2 = jax.random.normal(k3, (N2, C2), dtype=jnp.float32)
    lbs2 = jax.nn.softmax(jax.random.normal(k4, (N2, C2), dtype=jnp.float32), axis=1)

    loss2 = cross_entropy_loss(logits2, lbs2, tn=8, tc=128)
    jax.block_until_ready(loss2)
    ref2 = _reference(logits2, lbs2)
    assert jnp.allclose(loss2, ref2, atol=1e-4, rtol=1e-5), (loss2, ref2)

    print("KERNEL_OK")
</pallas_src>

<mosaic_0001>
module attributes {stable_mosaic.version = 11 : i64} {
  func.func @_ce_kernel(%arg0: i32, %arg1: i32, %arg2: memref<8x128xf32, #tpu.memory_space<vmem>>, %arg3: memref<8x128xf32, #tpu.memory_space<vmem>>, %arg4: memref<8x1xf32, #tpu.memory_space<vmem>>, %arg5: memref<8x1xf32, #tpu.memory_space<vmem>>, %arg6: memref<8x1xf32, #tpu.memory_space<vmem>>, %arg7: memref<8x1xf32, #tpu.memory_space<vmem>>, %arg8: memref<8x1xf32, #tpu.memory_space<vmem>>) attributes {dimension_semantics = [#tpu.dimension_semantics<parallel>, #tpu.dimension_semantics<arbitrary>], iteration_bounds = array<i64: 1, 1>, scalar_prefetch = 0 : i64, scratch_operands = 4 : i64, tpu.core_type = #tpu.core_type<tc>, window_params = [{transform_indices = @transform_0, window_bounds = array<i64: 8, 128>}, {transform_indices = @transform_1, window_bounds = array<i64: 8, 128>}, {transform_indices = @transform_2, window_bounds = array<i64: 8, 1>}]} {
    %c0_i32 = arith.constant 0 : i32
    %0 = arith.cmpi eq, %arg1, %c0_i32 : i32
    %1 = arith.extui %0 : i1 to i32
    %c0_i32_0 = arith.constant 0 : i32
    %2 = arith.cmpi ne, %1, %c0_i32_0 : i32
    scf.if %2 {
      %cst_25 = arith.constant 0xFF800000 : f32
      %35 = vector.broadcast %cst_25 : f32 to vector<8x1xf32>
      %c0_26 = arith.constant 0 : index
      %c0_27 = arith.constant 0 : index
      %36 = vector.load %arg5[%c0_26, %c0_27] : memref<8x1xf32, #tpu.memory_space<vmem>>, vector<8x1xf32>
      tpu.vector_store %arg5[%c0_26, %c0_27], %35 {strides = array<i32>} : memref<8x1xf32, #tpu.memory_space<vmem>>, vector<8x1xf32>,
      %cst_28 = arith.constant 0.000000e+00 : f32
      %37 = vector.broadcast %cst_28 : f32 to vector<8x1xf32>
      %c0_29 = arith.constant 0 : index
      %c0_30 = arith.constant 0 : index
      %38 = vector.load %arg6[%c0_29, %c0_30] : memref<8x1xf32, #tpu.memory_space<vmem>>, vector<8x1xf32>
      tpu.vector_store %arg6[%c0_29, %c0_30], %37 {strides = array<i32>} : memref<8x1xf32, #tpu.memory_space<vmem>>, vector<8x1xf32>,
      %cst_31 = arith.constant 0.000000e+00 : f32
      %39 = vector.broadcast %cst_31 : f32 to vector<8x1xf32>
      %c0_32 = arith.constant 0 : index
      %c0_33 = arith.constant 0 : index
      %40 = vector.load %arg7[%c0_32, %c0_33] : memref<8x1xf32, #tpu.memory_space<vmem>>, vector<8x1xf32>
      tpu.vector_store %arg7[%c0_32, %c0_33], %39 {strides = array<i32>} : memref<8x1xf32, #tpu.memory_space<vmem>>, vector<8x1xf32>,
      %cst_34 = arith.constant 0.000000e+00 : f32
      %41 = vector.broadcast %cst_34 : f32 to vector<8x1xf32>
      %c0_35 = arith.constant 0 : index
      %c0_36 = arith.constant 0 : index
      %42 = vector.load %arg8[%c0_35, %c0_36] : memref<8x1xf32, #tpu.memory_space<vmem>>, vector<8x1xf32>
      tpu.vector_store %arg8[%c0_35, %c0_36], %41 {strides = array<i32>} : memref<8x1xf32, #tpu.memory_space<vmem>>, vector<8x1xf32>,
    } else {
    }
    %c0 = arith.constant 0 : index
    %c0_1 = arith.constant 0 : index
    %3 = vector.load %arg2[%c0, %c0_1] : memref<8x128xf32, #tpu.memory_space<vmem>>, vector<8x128xf32>
    %c0_2 = arith.constant 0 : index
    %c0_3 = arith.constant 0 : index
    %4 = vector.load %arg3[%c0_2, %c0_3] : memref<8x128xf32, #tpu.memory_space<vmem>>, vector<8x128xf32>
    %c0_4 = arith.constant 0 : index
    %c0_5 = arith.constant 0 : index
    %5 = vector.load %arg5[%c0_4, %c0_5] : memref<8x1xf32, #tpu.memory_space<vmem>>, vector<8x1xf32>
    %cst = arith.constant dense<0xFF800000> : vector<8xf32>
    %6 = vector.multi_reduction <maximumf>, %3, %cst [1] : vector<8x128xf32> to vector<8xf32>
    %7 = vector.shape_cast %6 : vector<8xf32> to vector<8x1xf32>
    %8 = arith.maximumf %5, %7 : vector<8x1xf32>
    %c0_6 = arith.constant 0 : index
    %c0_7 = arith.constant 0 : index
    %9 = vector.load %arg6[%c0_6, %c0_7] : memref<8x1xf32, #tpu.memory_space<vmem>>, vector<8x1xf32>
    %10 = arith.subf %5, %8 : vector<8x1xf32>
    %11 = math.exp %10 : vector<8x1xf32>
    %12 = arith.mulf %9, %11 : vector<8x1xf32>
    %13 = vector.broadcast %8 : vector<8x1xf32> to vector<8x128xf32>
    %14 = arith.subf %3, %13 : vector<8x128xf32>
    %15 = math.exp %14 : vector<8x128xf32>
    %cst_8 = arith.constant dense<0.000000e+00> : vector<8xf32>
    %16 = vector.multi_reduction <add>, %15, %cst_8 [1] : vector<8x128xf32> to vector<8xf32>
    %17 = vector.shape_cast %16 : vector<8xf32> to vector<8x1xf32>
    %18 = arith.addf %12, %17 : vector<8x1xf32>
    %c0_9 = arith.constant 0 : index
    %c0_10 = arith.constant 0 : index
    %19 = vector.load %arg6[%c0_9, %c0_10] : memref<8x1xf32, #tpu.memory_space<vmem>>, vector<8x1xf32>
    tpu.vector_store %arg6[%c0_9, %c0_10], %18 {strides = array<i32>} : memref<8x1xf32, #tpu.memory_space<vmem>>, vector<8x1xf32>,
    %c0_11 = arith.constant 0 : index
    %c0_12 = arith.constant 0 : index
    %20 = vector.load %arg7[%c0_11, %c0_12] : memref<8x1xf32, #tpu.memory_space<vmem>>, vector<8x1xf32>
    %21 = arith.mulf %4, %3 : vector<8x128xf32>
    %cst_13 = arith.constant dense<0.000000e+00> : vector<8xf32>
    %22 = vector.multi_reduction <add>, %21, %cst_13 [1] : vector<8x128xf32> to vector<8xf32>
    %23 = vector.shape_cast %22 : vector<8xf32> to vector<8x1xf32>
    %24 = arith.addf %20, %23 : vector<8x1xf32>
    %c0_14 = arith.constant 0 : index
    %c0_15 = arith.constant 0 : index
    %25 = vector.load %arg7[%c0_14, %c0_15] : memref<8x1xf32, #tpu.memory_space<vmem>>, vector<8x1xf32>
    tpu.vector_store %arg7[%c0_14, %c0_15], %24 {strides = array<i32>} : memref<8x1xf32, #tpu.memory_space<vmem>>, vector<8x1xf32>,
    %c0_16 = arith.constant 0 : index
    %c0_17 = arith.constant 0 : index
    %26 = vector.load %arg8[%c0_16, %c0_17] : memref<8x1xf32, #tpu.memory_space<vmem>>, vector<8x1xf32>
    %cst_18 = arith.constant dense<0.000000e+00> : vector<8xf32>
    %27 = vector.multi_reduction <add>, %4, %cst_18 [1] : vector<8x128xf32> to vector<8xf32>
    %28 = vector.shape_cast %27 : vector<8xf32> to vector<8x1xf32>
    %29 = arith.addf %26, %28 : vector<8x1xf32>
    %c0_19 = arith.constant 0 : index
    %c0_20 = arith.constant 0 : index
    %30 = vector.load %arg8[%c0_19, %c0_20] : memref<8x1xf32, #tpu.memory_space<vmem>>, vector<8x1xf32>
    tpu.vector_store %arg8[%c0_19, %c0_20], %29 {strides = array<i32>} : memref<8x1xf32, #tpu.memory_space<vmem>>, vector<8x1xf32>,
    %c0_21 = arith.constant 0 : index
    %c0_22 = arith.constant 0 : index
    %31 = vector.load %arg5[%c0_21, %c0_22] : memref<8x1xf32, #tpu.memory_space<vmem>>, vector<8x1xf32>
    tpu.vector_store %arg5[%c0_21, %c0_22], %8 {strides = array<i32>} : memref<8x1xf32, #tpu.memory_space<vmem>>, vector<8x1xf32>,
    %c0_i32_23 = arith.constant 0 : i32
    %32 = arith.cmpi eq, %arg1, %c0_i32_23 : i32
    %33 = arith.extui %32 : i1 to i32
    %c0_i32_24 = arith.constant 0 : i32
    %34 = arith.cmpi ne, %33, %c0_i32_24 : i32
    scf.if %34 {
      %c0_25 = arith.constant 0 : index
      %c0_26 = arith.constant 0 : index
      %35 = vector.load %arg8[%c0_25, %c0_26] : memref<8x1xf32, #tpu.memory_space<vmem>>, vector<8x1xf32>
      %c0_27 = arith.constant 0 : index
      %c0_28 = arith.constant 0 : index
      %36 = vector.load %arg5[%c0_27, %c0_28] : memref<8x1xf32, #tpu.memory_space<vmem>>, vector<8x1xf32>
      %c0_29 = arith.constant 0 : index
      %c0_30 = arith.constant 0 : index
      %37 = vector.load %arg6[%c0_29, %c0_30] : memref<8x1xf32, #tpu.memory_space<vmem>>, vector<8x1xf32>
      %38 = math.log %37 : vector<8x1xf32>
      %39 = arith.addf %36, %38 : vector<8x1xf32>
      %40 = arith.mulf %35, %39 : vector<8x1xf32>
      %c0_31 = arith.constant 0 : index
      %c0_32 = arith.constant 0 : index
      %41 = vector.load %arg7[%c0_31, %c0_32] : memref<8x1xf32, #tpu.memory_space<vmem>>, vector<8x1xf32>
      %42 = arith.subf %40, %41 : vector<8x1xf32>
      %c0_33 = arith.constant 0 : index
      %c0_34 = arith.constant 0 : index
      %43 = vector.load %arg4[%c0_33, %c0_34] : memref<8x1xf32, #tpu.memory_space<vmem>>, vector<8x1xf32>
      tpu.vector_store %arg4[%c0_33, %c0_34], %42 {strides = array<i32>} : memref<8x1xf32, #tpu.memory_space<vmem>>, vector<8x1xf32>,
    } else {
    }
    return
  }
  func.func @transform_0(%arg0: i32, %arg1: i32) -> (i32, i32) {
    %c0_i32 = arith.constant 0 : i32
    return %arg0, %arg1 : i32, i32
  }
  func.func @transform_1(%arg0: i32, %arg1: i32) -> (i32, i32) {
    %c0_i32 = arith.constant 0 : i32
    return %arg0, %arg1 : i32, i32
  }
  func.func @transform_2(%arg0: i32, %arg1: i32) -> (i32, i32) {
    %c0_i32 = arith.constant 0 : i32
    %c0_i32_0 = arith.constant 0 : i32
    return %arg0, %c0_i32 : i32, i32
  }
}

</mosaic_0001>

<bundles_post_ra>
// kernel: tpu_custom_call.1
= control target key start
LH: loop header
LB: loop body
LE: loop exit
PB: predicated region body
PF: predicated region fallthrough
CT: control target
= control target key end

     0   :  { %7 = vsyncpa [#allocation7], 0  ;;  %s215_s0 = inlined_call_operand.hbm [shape: f32[8,128], index: 0, kind: input, shape index: {}]   ;;  %s216_s1 = inlined_call_operand.hbm [shape: f32[8,128], index: 1, kind: input, shape index: {}]   ;;  %s217_s2 = inlined_call_operand.vmem [shape: f32[8,1], index: 2, kind: output, shape index: {}]  }
   0x1   :  { %8 = vsyncpa [#allocation9], 0  ;;  %s159_s9 = smov [#allocation6]   ;;  %s160_s11 = smov [#allocation8]  }
   0x2   :  { %s15_s10 = sshll.u32 %s159_s9, 4  ;;  %s25_s12 = sshll.u32 %s160_s11, 4  ;;  %s16_s10 = int_to_ptr.vmem [resolvable:$true] %s15_s10  ;;  %s26_s12 = int_to_ptr.vmem [resolvable:$true] %s25_s12 }
   0x3   :  { %s111_s15 = scalar_lea.hbm %s215_s0, 128 }
   0x4   :  { %p112_p0 = scmp.ne.s32.totalorder %s215_s0, %s111_s15  ;;  %p115_p1 = scmp.lt.u32.totalorder %s111_s15, %s215_s0 }
   0x6   :  { %p117_p2 = pnand %p115_p1, %p112_p0 }
   0x8   :  { %120 = shalt.err (!%p117_p2)
}
   0x9   :  { %s121_s20 = scalar_lea.vmem %s16_s10, 128  ;;  %p126_p4 = scmp.lt.s32.totalorder %s16_s10, %s16_s10 }
   0xa   :  { %p122_p3 = scmp.ne.s32.totalorder %s16_s10, %s121_s20  ;;  %p127_p5 = scmp.lt.s32.totalorder %s121_s20, %s121_s20 }
   0xc   :  { %p128_p6 = por %p127_p5, %p126_p4 }
   0xe   :  { %p129_p7 = pnand %p128_p6, %p122_p3 }
  0x10   :  { %132 = shalt.err (!%p129_p7)
}
  0x11   :  { %18 = dma.hbm_to_vmem [thread:$0]  %s215_s0, 128, %s16_s10, [#allocation7]  }
  0x12   :  { %s133_s25 = scalar_lea.hbm %s216_s1, 128 }
  0x13   :  { %p134_p8 = scmp.ne.s32.totalorder %s216_s1, %s133_s25  ;;  %p137_p9 = scmp.lt.u32.totalorder %s133_s25, %s216_s1 }
  0x15   :  { %p139_p10 = pnand %p137_p9, %p134_p8 }
  0x17   :  { %142 = shalt.err (!%p139_p10)
}
  0x18   :  { %s143_s30 = scalar_lea.vmem %s26_s12, 128  ;;  %p148_p12 = scmp.lt.s32.totalorder %s26_s12, %s26_s12 }
  0x19   :  { %p144_p11 = scmp.ne.s32.totalorder %s26_s12, %s143_s30  ;;  %p149_p13 = scmp.lt.s32.totalorder %s143_s30, %s143_s30 }
  0x1b   :  { %p150_p0 = por %p149_p13, %p148_p12 }
  0x1d   :  { %p151_p1 = pnand %p150_p0, %p144_p11 }
  0x1f   :  { %154 = shalt.err (!%p151_p1)
}
  0x20   :  { %28 = dma.hbm_to_vmem [thread:$0]  %s216_s1, 128, %s26_s12, [#allocation9]  }
  0x21   :  { %155 = dma.done.wait [#allocation7], 128  }
  0x22   :  { %156 = vsyncadd [#allocation7], 4294967168 }
  0x23   :  { %157 = dma.done.wait [#allocation9], 128  }
  0x24   :  { %158 = vsyncadd [#allocation9], 4294967168  ;;  %vm39_vm0 = vcmask 7168   ;;  %v161_v0 = vmov -inf   ;;  %v44_v1 = vld [vmem:[#allocation6] sm:$0xff]  ;;  %v162_v2 = vmov 0  }
  0x25   :  { %40 = vst.msk [vmem:[#allocation2] sm:$0xff] %vm39_vm0, %v161_v0  ;;  %47 = vmax.xlane.f32.xlu0 %v44_v1  ;;  %v163_v3 = vmov 0.0   ;;  %v45_v12 = vld [vmem:[#allocation8] sm:$0xff] }
  0x26   :  { %104 = vset.pattern.permute.xlu0 %v162_v2  ;;  %41 = vst.msk [vmem:[#allocation3] sm:$0xff] %vm39_vm0, %v163_v3  ;;  %42 = vst.msk [vmem:[#allocation4] sm:$0xff] %vm39_vm0, %v163_v3  ;;  %v69_v13 = vmul.f32 %v45_v12, %v44_v1 }
  0x27   :  { %43 = vst.msk [vmem:[#allocation5] sm:$0xff] %vm39_vm0, %v163_v3 }
  0x2c   :  { %v46_v4 = vld [vmem:[#allocation2] sm:$0xff] }
  0x2d   :  { %v50_v16 = vld [vmem:[#allocation3] sm:$0xff]  ;;  %v68_v23 = vld [vmem:[#allocation4] sm:$0xff] }
  0x2e   :  { %v74_v20 = vld [vmem:[#allocation5] sm:$0xff] }
  0xb2   :  { %v48_v5 = vpop.xlane.xlu0 %47 }
  0xb3   :  { %v49_v6 = vmax.f32 %v46_v4, %v48_v5 }
  0xb5   :  { %v51_v7 = vsub.f32 %v46_v4, %v49_v6  ;;  %79 = vst.msk [vmem:[#allocation2] sm:$0xff] %vm39_vm0, %v49_v6  ;;  %57 = vperm.xlu0 %104, %v49_v6  }
  0xb7   :  { %v52_v14 = vmul.f32 1.442695, %v51_v7 }
  0xbc   :  { %v84_v29 = vld [vmem:[#allocation2] sm:$0xff] }
 0x134   :  { %v58_v8 = vpop.permute.xlu0 %57 }
 0x135   :  { %v60_v9 = vsub.f32 %v44_v1, %v58_v8 }
 0x137   :  { %v61_v10 = vmul.f32 1.442695, %v60_v9 }
 0x139   :  { %105 = vpow2.f32 %v61_v10 }
 0x13a   :  { %107 = vpow2.f32 %v52_v14 }
 0x143   :  { %v106_v11 = vpop.eup %105 }
 0x144   :  { %63 = vadd.xlane.f32.xlu1 %v106_v11  ;;  %v108_v15 = vpop.eup %107 }
 0x145   :  { %v54_v17 = vmul.f32 %v108_v15, %v50_v16 }
 0x148   :  { %75 = vadd.xlane.f32.xlu1 %v45_v12 }
 0x14c   :  { %70 = vadd.xlane.f32.xlu1 %v69_v13 }
 0x1d1   :  { %v64_v18 = vpop.xlane.xlu1 %63 }
 0x1d2   :  { %v65_v19 = vadd.f32 %v64_v18, %v54_v17 }
 0x1d4   :  { %67 = vst.msk [vmem:[#allocation3] sm:$0xff] %vm39_vm0, %v65_v19 }
 0x1d5   :  { %v76_v21 = vpop.xlane.xlu1 %75 }
 0x1d6   :  { %v77_v22 = vadd.f32 %v76_v21, %v74_v20 }
 0x1d8   :  { %78 = vst.msk [vmem:[#allocation5] sm:$0xff] %vm39_vm0, %v77_v22 }
 0x1d9   :  { %v71_v24 = vpop.xlane.xlu1 %70 }
 0x1da   :  { %v72_v25 = vadd.f32 %v71_v24, %v68_v23 }
 0x1db   :  { %v85_v26 = vld [vmem:[#allocation3] sm:$0xff] }
 0x1dc   :  { %109 = vlog2.f32 %v85_v26  ;;  %73 = vst.msk [vmem:[#allocation4] sm:$0xff] %vm39_vm0, %v72_v25 }
 0x1df   :  { %v83_v31 = vld [vmem:[#allocation5] sm:$0xff] }
 0x1e3   :  { %v90_v32 = vld [vmem:[#allocation4] sm:$0xff] }
 0x1e6   :  { %v110_v27 = vpop.eup %109 }
 0x1e7   :  { %v87_v28 = vmul.f32 0.6931472, %v110_v27 }
 0x1e9   :  { %v88_v30 = vadd.f32 %v87_v28, %v84_v29 }
 0x1eb   :  { %v89_v33 = vmul.f32 %v88_v30, %v83_v31 }
 0x1ed   :  { %v91_v34 = vsub.f32 %v89_v33, %v90_v32 }
 0x1ef   :  { %92 = vst.msk [vmem:[%s217_s2] sm:$0xff] %vm39_vm0, %v91_v34 }
 0x1f0   :  { %97 = vsyncpa [#allocation7], 1 }
 0x1f1   :  { %98 = vsyncpa [#allocation9], 1 }

</bundles_post_ra>
